<compile_context>
chip_gen: v6e
topology: v6e:2x2x1
jax: 0.10.0
libtpu: 0.0.40
codegen_flags: <defaults>
</compile_context>

<pallas_src>
import functools

import jax
import jax.numpy as jnp
from jax import lax
from jax.experimental import pallas as pl
from jax.experimental.pallas import tpu as pltpu


_MAX_CHUNKS_PER_BLOCK = 32          # bounds the unrolled 128-lane reduction (4096 lanes/block)


def _vmem_budgets():
    """Derive VMEM budgets from the actual chip instead of hard-coding."""
    try:
        cap = int(pltpu.get_tpu_info().vmem_capacity_bytes)
    except Exception:                # conservative (v7x-safe) fallback
        cap = 64 * 1024 * 1024
    vmem_limit = int(cap * 0.85)     # explicit scoped-VMEM limit
    slab_budget = int(cap * 0.55)    # budget for the multi-buffered x slab
    return vmem_limit, slab_budget


def _pick_tiles(n, c, hw, itemsize, slab_budget):
    """Choose (b_tile, hw_tile, hw_padded, n_buffers) against the VMEM budget."""
    lane_cap = _MAX_CHUNKS_PER_BLOCK * 128
    hw128 = ((hw + 127) // 128) * 128

    # Keep the 'parallel' batch grid axis at extent >= 2 when N > 1 so both
    # TensorCores get work on megacore parts (v7x); harmless on 1-TC chips.
    max_b = n if n == 1 else max(1, n // 2)
    b_candidates = [d for d in range(max_b, 0, -1) if n % d == 0]

    # Case 1: whole (128-padded) H*W resident per block, double-buffered.
    if hw128 <= lane_cap:
        for bt in b_candidates:
            if 2 * bt * c * hw128 * itemsize <= slab_budget:
                return bt, hw128, hw128, 2

    # Case 2: stream H*W through VMEM-budgeted tiles, triple-buffered, b_tile=1.
    nbuf = 3
    lt = min(lane_cap, hw128, slab_budget // (nbuf * c * itemsize))
    lt = max(128, (lt // 128) * 128)
    hw_padded = ((hw + lt - 1) // lt) * lt
    return 1, lt, hw_padded, nbuf


def _channel_attention_kernel(x_ref, w1_ref, w2_ref, o_ref, sum_acc, max_acc, *,
                              inv_hw, hw_true, hw_tile, num_hw_blocks,
                              num_chunks, pad_chunks):
    """Grid = (batch_blocks, hw_blocks); hw (=H*W) is the trailing reduction axis."""
    l = pl.program_id(1)

    @pl.when(l == 0)
    def _init():
        sum_acc[...] = jnp.zeros_like(sum_acc)
        max_acc[...] = jnp.full_like(max_acc, -jnp.inf)

    x = x_ref[...].astype(jnp.float32)               # (Bt, C, hw_tile), lanes = hw_tile

    lane = None
    if pad_chunks:                                   # only traced when padding exists
        lane = lax.broadcasted_iota(jnp.int32, (x.shape[0], x.shape[1], 128), 2)

    def chunk(k):                                    # 128-aligned lane slice: vreg select
        return x[:, :, k * 128:(k + 1) * 128]

    def masked_for_max(ck, k):
        if k not in pad_chunks:                      # static: only tail chunks need it
            return ck
        gpos = l * hw_tile + k * 128 + lane
        return jnp.where(gpos < hw_true, ck, -jnp.inf)

    # Lane-wide partial reduction on the VPU (no XLU in the steady-state loop).
    s = chunk(0)
    m = masked_for_max(s, 0)
    for k in range(1, num_chunks):
        ck = chunk(k)
        s = s + ck
        m = jnp.maximum(m, masked_for_max(ck, k))

    sum_acc[...] += s                                # running sum  (avg pool)
    max_acc[...] = jnp.maximum(max_acc[...], m)      # running max  (max pool)

    @pl.when(l == num_hw_blocks - 1)
    def _finalize():
        avg = jnp.sum(sum_acc[...], axis=-1) * inv_hw        # (Bt, C)  one XLU reduce
        mxp = jnp.max(max_acc[...], axis=-1)                  # (Bt, C)
        pooled = jnp.concatenate([avg, mxp], axis=0)          # (2*Bt, C): fused FC pass
        h = lax.dot_general(pooled, w1_ref[...], (((1,), (1,)), ((), ())),
                            preferred_element_type=jnp.float32)    # (2*Bt, MID)
        h = jnp.maximum(h, 0.0)                                     # ReLU
        y = lax.dot_general(h, w2_ref[...], (((1,), (1,)), ((), ())),
                            preferred_element_type=jnp.float32)    # (2*Bt, C)
        bt = avg.shape[0]
        o_ref[...] = jax.nn.sigmoid(y[:bt] + y[bt:]).astype(o_ref.dtype)


def channel_attention(x, w1, w2):
    """x: (N, C, H, W).  w1: (C//16, C), w2: (C, C//16) 1x1-conv weights (no bias).

    Returns sigmoid(fc(avgpool(x)) + fc(maxpool(x))) with shape (N, C, 1, 1).
    """
    n, c, h, w = x.shape
    mid = w1.shape[0]
    assert w1.shape == (mid, c) and w2.shape == (c, mid), (w1.shape, w2.shape)
    hw = h * w

    vmem_limit, slab_budget = _vmem_budgets()
    b_tile, hw_tile, hw_padded, nbuf = _pick_tiles(n, c, hw, x.dtype.itemsize,
                                                   slab_budget)
    num_b_blocks = n // b_tile
    num_hw_blocks = hw_padded // hw_tile
    num_chunks = hw_tile // 128

    # Stream x in its model dtype; cast to f32 only inside the kernel.
    x_flat = x.reshape(n, c, hw)
    if hw_padded != hw:
        # Zero pad (sum-safe; max pool masks padded lanes to -inf in-kernel).
        x_flat = jnp.pad(x_flat, ((0, 0), (0, 0), (0, hw_padded - hw)))

    # Statically, only the tail chunks of the last hw block can contain padding.
    pad_chunks = tuple(
        k for k in range(num_chunks)
        if hw_padded != hw and (num_hw_blocks - 1) * hw_tile + (k + 1) * 128 > hw)

    kernel = functools.partial(
        _channel_attention_kernel,
        inv_hw=float(1.0 / hw), hw_true=hw, hw_tile=hw_tile,
        num_hw_blocks=num_hw_blocks, num_chunks=num_chunks, pad_chunks=pad_chunks)

    x_idx = lambda b, l: (b, 0, l)
    if nbuf == 2:
        x_spec = pl.BlockSpec((b_tile, c, hw_tile), x_idx)
    else:
        try:
            x_spec = pl.BlockSpec((b_tile, c, hw_tile), x_idx,
                                  pipeline_mode=pl.Buffered(nbuf))
        except TypeError:            # jax without pipeline_mode: 2-deep is still correct
            x_spec = pl.BlockSpec((b_tile, c, hw_tile), x_idx)

    out = pl.pallas_call(
        kernel,
        out_shape=jax.ShapeDtypeStruct((num_b_blocks, b_tile, c), x.dtype),
        grid_spec=pltpu.PrefetchScalarGridSpec(
            num_scalar_prefetch=0,
            grid=(num_b_blocks, num_hw_blocks),
            in_specs=[
                x_spec,
                pl.BlockSpec((mid, c), lambda b, l: (0, 0)),   # resident FC weights
                pl.BlockSpec((c, mid), lambda b, l: (0, 0)),
            ],
            # Lane-dense output block (minor dim = C); leading grid dim squeezed.
            out_specs=pl.BlockSpec((None, b_tile, c), lambda b, l: (b, 0, 0)),
            scratch_shapes=[
                pltpu.VMEM((b_tile, c, 128), jnp.float32),     # lane-wide running sum
                pltpu.VMEM((b_tile, c, 128), jnp.float32),     # lane-wide running max
            ],
        ),
        compiler_params=pltpu.CompilerParams(
            dimension_semantics=("parallel", "arbitrary"),
            vmem_limit_bytes=vmem_limit,
        ),
    )(x_flat, w1, w2)

    return out.reshape(n, c, 1, 1)


def channel_attention_reference(x, w1, w2):
    """Pure-jnp reference (same math as the PyTorch forward, eval mode)."""
    avg = jnp.mean(x, axis=(2, 3))                   # (N, C)
    mx = jnp.max(x, axis=(2, 3))                     # (N, C)

    def fc(v):
        return jnp.maximum(v @ w1.T, 0.0) @ w2.T

    return jax.nn.sigmoid(fc(avg) + fc(mx))[:, :, None, None]


if __name__ == "__main__":
    key = jax.random.PRNGKey(0)
    k_x, k_w1, k_w2 = jax.random.split(key, 3)

    # in_planes must be >= 16 for the module's hard-coded C // 16 bottleneck.
    n, c, h, w = 2, 32, 16, 16                       # hidden = 32 // 16 = 2
    mid = c // 16
    x = jax.random.normal(k_x, (n, c, h, w), jnp.float32)
    # 1x1-conv weights (bias=False), stored as (out_ch, in_ch) matrices.
    w1 = jax.random.normal(k_w1, (mid, c), jnp.float32) * 0.2
    w2 = jax.random.normal(k_w2, (c, mid), jnp.float32) * 0.5

    out = jax.block_until_ready(channel_attention(x, w1, w2))
    ref = channel_attention_reference(x, w1, w2)

    assert out.shape == (n, c, 1, 1), out.shape
    assert jnp.allclose(out, ref, atol=1e-5, rtol=1e-5), "mismatch vs reference"
    print("KERNEL_OK")
</pallas_src>

<mosaic_0001>
module attributes {stable_mosaic.version = 11 : i64} {
  func.func @_channel_attention_kernel(%arg0: i32, %arg1: i32, %arg2: memref<1x32x256xf32, #tpu.memory_space<vmem>>, %arg3: memref<2x32xf32, #tpu.memory_space<vmem>>, %arg4: memref<32x2xf32, #tpu.memory_space<vmem>>, %arg5: memref<1x1x32xf32, #tpu.memory_space<vmem>>, %arg6: memref<1x32x128xf32, #tpu.memory_space<vmem>>, %arg7: memref<1x32x128xf32, #tpu.memory_space<vmem>>) attributes {dimension_semantics = [#tpu.dimension_semantics<parallel>, #tpu.dimension_semantics<arbitrary>], iteration_bounds = array<i64: 2, 1>, scalar_prefetch = 0 : i64, scratch_operands = 2 : i64, tpu.core_type = #tpu.core_type<tc>, window_params = [{transform_indices = @transform_0, window_bounds = array<i64: 1, 32, 256>}, {pipeline_mode = #tpu.pipeline_mode<synchronous>, transform_indices = @transform_1, window_bounds = array<i64: 2, 32>}, {pipeline_mode = #tpu.pipeline_mode<synchronous>, transform_indices = @transform_2, window_bounds = array<i64: 32, 2>}, {transform_indices = @transform_3, window_bounds = array<i64: 1, 1, 32>}]} {
    %c0_i32 = arith.constant 0 : i32
    %0 = arith.cmpi eq, %arg1, %c0_i32 : i32
    %1 = arith.extui %0 : i1 to i32
    %c0_i32_0 = arith.constant 0 : i32
    %2 = arith.cmpi ne, %1, %c0_i32_0 : i32
    scf.if %2 {
      %cst = arith.constant 0.000000e+00 : f32
      %17 = vector.broadcast %cst : f32 to vector<1x32x128xf32>
      %c0_17 = arith.constant 0 : index
      %c0_18 = arith.constant 0 : index
      %c0_19 = arith.constant 0 : index
      %18 = vector.load %arg6[%c0_17, %c0_18, %c0_19] : memref<1x32x128xf32, #tpu.memory_space<vmem>>, vector<1x32x128xf32>
      tpu.vector_store %arg6[%c0_17, %c0_18, %c0_19], %17 {strides = array<i32>} : memref<1x32x128xf32, #tpu.memory_space<vmem>>, vector<1x32x128xf32>,
      %cst_20 = arith.constant 0xFF800000 : f32
      %19 = vector.broadcast %cst_20 : f32 to vector<1x32x128xf32>
      %c0_21 = arith.constant 0 : index
      %c0_22 = arith.constant 0 : index
      %c0_23 = arith.constant 0 : index
      %20 = vector.load %arg7[%c0_21, %c0_22, %c0_23] : memref<1x32x128xf32, #tpu.memory_space<vmem>>, vector<1x32x128xf32>
      tpu.vector_store %arg7[%c0_21, %c0_22, %c0_23], %19 {strides = array<i32>} : memref<1x32x128xf32, #tpu.memory_space<vmem>>, vector<1x32x128xf32>,
    } else {
    }
    %c0 = arith.constant 0 : index
    %c0_1 = arith.constant 0 : index
    %c0_2 = arith.constant 0 : index
    %3 = vector.load %arg2[%c0, %c0_1, %c0_2] : memref<1x32x256xf32, #tpu.memory_space<vmem>>, vector<1x32x256xf32>
    %4 = vector.extract_strided_slice %3 {offsets = [0, 0, 0], sizes = [1, 32, 128], strides = [1, 1, 1]} : vector<1x32x256xf32> to vector<1x32x128xf32>
    %5 = vector.extract_strided_slice %3 {offsets = [0, 0, 128], sizes = [1, 32, 128], strides = [1, 1, 1]} : vector<1x32x256xf32> to vector<1x32x128xf32>
    %6 = arith.addf %4, %5 : vector<1x32x128xf32>
    %7 = arith.maximumf %4, %5 : vector<1x32x128xf32>
    %c0_3 = arith.constant 0 : index
    %c0_4 = arith.constant 0 : index
    %c0_5 = arith.constant 0 : index
    %8 = vector.load %arg6[%c0_3, %c0_4, %c0_5] : memref<1x32x128xf32, #tpu.memory_space<vmem>>, vector<1x32x128xf32>
    %9 = arith.addf %8, %6 : vector<1x32x128xf32>
    %c0_6 = arith.constant 0 : index
    %c0_7 = arith.constant 0 : index
    %c0_8 = arith.constant 0 : index
    %10 = vector.load %arg6[%c0_6, %c0_7, %c0_8] : memref<1x32x128xf32, #tpu.memory_space<vmem>>, vector<1x32x128xf32>
    tpu.vector_store %arg6[%c0_6, %c0_7, %c0_8], %9 {strides = array<i32>} : memref<1x32x128xf32, #tpu.memory_space<vmem>>, vector<1x32x128xf32>,
    %c0_9 = arith.constant 0 : index
    %c0_10 = arith.constant 0 : index
    %c0_11 = arith.constant 0 : index
    %11 = vector.load %arg7[%c0_9, %c0_10, %c0_11] : memref<1x32x128xf32, #tpu.memory_space<vmem>>, vector<1x32x128xf32>
    %12 = arith.maximumf %11, %7 : vector<1x32x128xf32>
    %c0_12 = arith.constant 0 : index
    %c0_13 = arith.constant 0 : index
    %c0_14 = arith.constant 0 : index
    %13 = vector.load %arg7[%c0_12, %c0_13, %c0_14] : memref<1x32x128xf32, #tpu.memory_space<vmem>>, vector<1x32x128xf32>
    tpu.vector_store %arg7[%c0_12, %c0_13, %c0_14], %12 {strides = array<i32>} : memref<1x32x128xf32, #tpu.memory_space<vmem>>, vector<1x32x128xf32>,
    %c0_i32_15 = arith.constant 0 : i32
    %14 = arith.cmpi eq, %arg1, %c0_i32_15 : i32
    %15 = arith.extui %14 : i1 to i32
    %c0_i32_16 = arith.constant 0 : i32
    %16 = arith.cmpi ne, %15, %c0_i32_16 : i32
    scf.if %16 {
      %c0_17 = arith.constant 0 : index
      %c0_18 = arith.constant 0 : index
      %c0_19 = arith.constant 0 : index
      %17 = vector.load %arg6[%c0_17, %c0_18, %c0_19] : memref<1x32x128xf32, #tpu.memory_space<vmem>>, vector<1x32x128xf32>
      %cst = arith.constant dense<0.000000e+00> : vector<1x32xf32>
      %18 = vector.multi_reduction <add>, %17, %cst [2] : vector<1x32x128xf32> to vector<1x32xf32>
      %cst_20 = arith.constant 3.906250e-03 : f32
      %19 = vector.broadcast %cst_20 : f32 to vector<1x32xf32>
      %20 = arith.mulf %18, %19 : vector<1x32xf32>
      %c0_21 = arith.constant 0 : index
      %c0_22 = arith.constant 0 : index
      %c0_23 = arith.constant 0 : index
      %21 = vector.load %arg7[%c0_21, %c0_22, %c0_23] : memref<1x32x128xf32, #tpu.memory_space<vmem>>, vector<1x32x128xf32>
      %cst_24 = arith.constant dense<0xFF800000> : vector<1x32xf32>
      %22 = vector.multi_reduction <maximumf>, %21, %cst_24 [2] : vector<1x32x128xf32> to vector<1x32xf32>
      %23 = tpu.concatenate %20, %22 in 0 : vector<1x32xf32>, vector<1x32xf32> -> vector<2x32xf32>
      %c0_25 = arith.constant 0 : index
      %c0_26 = arith.constant 0 : index
      %24 = vector.load %arg3[%c0_25, %c0_26] : memref<2x32xf32, #tpu.memory_space<vmem>>, vector<2x32xf32>
      %cst_27 = arith.constant dense<0.000000e+00> : vector<2x2xf32>
      %25 = tpu.matmul %23, %24, %cst_27 {dimension_numbers = #tpu.dot_dimension_numbers<[1], [1], [0], [0], [0, 0, 1, 0], [], []>} : vector<2x32xf32>, vector<2x32xf32>, vector<2x2xf32> -> vector<2x2xf32>
      %cst_28 = arith.constant 0.000000e+00 : f32
      %26 = vector.broadcast %cst_28 : f32 to vector<2x2xf32>
      %27 = arith.maximumf %25, %26 : vector<2x2xf32>
      %c0_29 = arith.constant 0 : index
      %c0_30 = arith.constant 0 : index
      %28 = vector.load %arg4[%c0_29, %c0_30] : memref<32x2xf32, #tpu.memory_space<vmem>>, vector<32x2xf32>
      %cst_31 = arith.constant dense<0.000000e+00> : vector<2x32xf32>
      %29 = tpu.matmul %27, %28, %cst_31 {dimension_numbers = #tpu.dot_dimension_numbers<[1], [1], [0], [0], [0, 0, 1, 0], [], []>} : vector<2x2xf32>, vector<32x2xf32>, vector<2x32xf32> -> vector<2x32xf32>
      %30 = vector.extract_strided_slice %29 {offsets = [0, 0], sizes = [1, 32], strides = [1, 1]} : vector<2x32xf32> to vector<1x32xf32>
      %31 = vector.extract_strided_slice %29 {offsets = [1, 0], sizes = [1, 32], strides = [1, 1]} : vector<2x32xf32> to vector<1x32xf32>
      %32 = arith.addf %30, %31 : vector<1x32xf32>
      %33 = arith.negf %32 : vector<1x32xf32>
      %34 = math.exp %33 : vector<1x32xf32>
      %cst_32 = arith.constant 1.000000e+00 : f32
      %35 = vector.broadcast %cst_32 : f32 to vector<1x32xf32>
      %36 = arith.addf %35, %34 : vector<1x32xf32>
      %37 = arith.divf %35, %36 : vector<1x32xf32>
      %c0_33 = arith.constant 0 : index
      %c0_34 = arith.constant 0 : index
      %c0_35 = arith.constant 0 : index
      %38 = vector.load %arg5[%c0_33, %c0_34, %c0_35] : memref<1x1x32xf32, #tpu.memory_space<vmem>>, vector<1x1x32xf32>
      %39 = vector.shape_cast %38 : vector<1x1x32xf32> to vector<1x32xf32>
      %40 = vector.shape_cast %37 : vector<1x32xf32> to vector<1x1x32xf32>
      tpu.vector_store %arg5[%c0_33, %c0_34, %c0_35], %40 {strides = array<i32>} : memref<1x1x32xf32, #tpu.memory_space<vmem>>, vector<1x1x32xf32>,
    } else {
    }
    return
  }
  func.func @transform_0(%arg0: i32, %arg1: i32) -> (i32, i32, i32) {
    %c0_i32 = arith.constant 0 : i32
    %c0_i32_0 = arith.constant 0 : i32
    return %arg0, %c0_i32, %arg1 : i32, i32, i32
  }
  func.func @transform_1(%arg0: i32, %arg1: i32) -> (i32, i32) {
    %c0_i32 = arith.constant 0 : i32
    %c0_i32_0 = arith.constant 0 : i32
    %c0_i32_1 = arith.constant 0 : i32
    return %c0_i32, %c0_i32_0 : i32, i32
  }
  func.func @transform_2(%arg0: i32, %arg1: i32) -> (i32, i32) {
    %c0_i32 = arith.constant 0 : i32
    %c0_i32_0 = arith.constant 0 : i32
    %c0_i32_1 = arith.constant 0 : i32
    return %c0_i32, %c0_i32_0 : i32, i32
  }
  func.func @transform_3(%arg0: i32, %arg1: i32) -> (i32, i32, i32) {
    %c0_i32 = arith.constant 0 : i32
    %c0_i32_0 = arith.constant 0 : i32
    %c0_i32_1 = arith.constant 0 : i32
    return %arg0, %c0_i32, %c0_i32_0 : i32, i32, i32
  }
}

</mosaic_0001>

<bundles_post_ra>
// kernel: tpu_custom_call.1
= control target key start
LH: loop header
LB: loop body
LE: loop exit
PB: predicated region body
PF: predicated region fallthrough
CT: control target
= control target key end

     0   :  { %8 = vsyncpa [#allocation5], 0  ;;  %s1030_s0 = inlined_call_operand.hbm [shape: f32[2,32,256], index: 0, kind: input, shape index: {}]   ;;  %s1031_s1 = inlined_call_operand.vmem [shape: f32[2,32], index: 1, kind: input, shape index: {}]   ;;  %s1032_s2 = inlined_call_operand.vmem [shape: f32[32,2], index: 2, kind: input, shape index: {}]   ;;  %s1033_s3 = inlined_call_operand.hbm [shape: f32[2,1,32], index: 3, kind: output, shape index: {}]  }
   0x1   :  { %10 = vsyncpa [#allocation5 + $0x1], 0 }
   0x2   :  { %11 = vsyncpa [#allocation6], 0 }
   0x3   :  { %13 = vsyncpa [#allocation6 + $0x1], 0  ;;  %s867_s12 = smov 0   ;;  %s869_s13 = smov 0  }
   0x4   :  { %s871_s14 = smov 0   ;;  %s873_s15 = smov 0  }
   0x5   :  { %s875_s16 = smov 0   ;;  %s877_s17 = smov 0  }
   0x6 LB: > { %s617_s18 = sadd.s32 4294967295, %s839_s17   ;;  %s618_s19 = sadd.s32 4294967294, %s839_s17   ;;  %s839_s17 = sphi %s877_s17, %s19_s17   ;;  %s835_s16 = sphi %s875_s16, %s1044_s16   ;;  %s831_s15 = sphi %s873_s15, %s1043_s15   ;;  %s827_s14 = sphi %s871_s14, %s1042_s14   ;;  %s823_s13 = sphi %s869_s13, %s1041_s13   ;;  %s819_s12 = sphi %s867_s12, %s1040_s12  }
   0x7   : > { %s31_s20 = sadd.s32 1, %s835_s16  ;;  %s40_s21 = sadd.s32 1, %s827_s14 }
   0x8   : > { %p33_p0 = scmp.ge.s32.totalorder %s31_s20, 2  ;;  %p47_p1 = scmp.ne.s32.totalorder %s827_s14, %s823_s13 }
   0x9   : > { %p48_p2 = scmp.eq.s32.totalorder %s839_s17, 0  ;;  %p53_p3 = scmp.ne.s32.totalorder %s823_s13, %s819_s12 }
   0xa   : > { %s1046_s20 = smov (%p33_p0, %s31_s20), 0  ;;  %p54_p5 = scmp.eq.s32.totalorder %s617_s18, 0 }
   0xb   : > { %p908_p4 = por %p48_p2, %p47_p1  ;;  %s35_s23 = ssub.s32 %s835_s16, %s1046_s20 }
   0xc   : > { %p119_p6 = scmp.eq.s32.totalorder %s617_s18, 1  ;;  %p38_p7 = scmp.eq.s32.totalorder %s35_s23, 0 }
   0xd   : > { %p914_p8 = por %p54_p5, %p53_p3  ;;  %p125_p10 = scmp.eq.s32.totalorder %s618_s19, 1 }
   0xe   : > { %p918_p9 = por %p119_p6, %p47_p1  ;;  %p673_p13 = scmp.lt.s32.totalorder %s839_s17, 2 }
   0xf   : > { %s923_s26 = scalar_select %p38_p7, %s827_s14, %s40_s21  }
  0x10   : > { %p925_p11 = por %p125_p10, %p53_p3  ;;  %s151_s28 = sand.u32 1, %s827_s14  }
  0x11   : > { %s621_s29 = sshll.u32 %s151_s28, 6  ;;  %s637_s30 = sshll.u32 %s835_s16, 10 }
  0x12   : > { %s163_s6 = scalar_lea.hbm %s1030_s0, %s637_s30  ;;  %s155_s7 = scalar_lea.vmem [#allocation4], %s621_s29 }
  0x13   : > { %s164_s8 = sshll.u32 %s155_s7, 4  ;;  %p938_p0 = pnand %p673_p13, %p908_p4  ;;  %s165_s8 = int_to_ptr.vmem [resolvable:$true] %s164_s8 }
  0x14   : > { %p624_p1 = scmp.ge.s32.totalorder %s839_s17, 1  ;;  %s152_s10 = scalar_lea.sflag [#allocation5], %s151_s28 }
  0x15   : > { %p733_p2 = pneg %p938_p0  ;;  %s744_s11 = scalar_lea.vmem %s165_s8, 1024 }
  0x16   : > { %p745_p3 = scmp.ne.s32.totalorder %s165_s8, %s744_s11  ;;  %s841_s18 = smov [#allocation4]  }
  0x17   : > { %s749_s19 = sshll.u32 %s841_s18, 4  ;;  %s750_s19 = int_to_ptr.vmem [resolvable:$false] %s749_s19 }
  0x18   : > { %p747_p5 = pnand %p745_p3, %p733_p2  ;;  %s751_s21 = scalar_lea.vmem %s750_s19, 2048 }
  0x19   : > { %p752_p7 = scmp.lt.s32.totalorder %s165_s8, %s750_s19  ;;  %p753_p10 = scmp.lt.s32.totalorder %s751_s21, %s744_s11 }
  0x1a   : > { %p748_p6 = pneg %p747_p5 }
  0x1b   : > { %p754_p12 = por %p753_p10, %p752_p7 }
  0x1d   : > { %p755_p4 = pnand %p754_p12, %p748_p6 }
  0x1f   : > { %758 = shalt.err (!%p755_p4)
}
  0x20   : > { %s842_s22 = smov 256   ;;  %s843_s23 = smov 16  }
  0x21   : > { %668 = dma.hbm_to_vmem [thread:$0]  (!%p938_p0), %s163_s6, 1024, %s165_s8, %s152_s10, %s842_s22, %s842_s22, %s843_s23  }
  0x22   : > { %p172_p13 = scmp.lt.s32.totalorder %s839_s17, 3 }
  0x24   : > { %p173_p2 = pnand %p624_p1, %p172_p13 }
  0x25   : > { %s951_s28 = sand.u32 (!%p173_p2), 1, %s823_s13  }
  0x26   : > { %176 = sbr.rel (%p173_p2) target bundleno = 640 (0x280), region = 32  ;;  %s625_s29 = sshll.u32 (!%p173_p2), %s951_s28, 6 }
  0x27   : > { %s179_s30 = scalar_lea.sflag (!%p173_p2), [#allocation5], %s951_s28  ;;  %s182_s4 = scalar_lea.vmem (!%p173_p2), [#allocation4], %s625_s29 }
  0x2b   : > { %810 = dma.done.wait (%p914_p8), %s179_s30, 1024  }
  0x2c   : > { %812 = vsyncadd (%p914_p8), %s179_s30, 4294966272  ;;  %v221_v0 = vld [vmem:[%s182_s4 + $0x20] sm:$0xff]  ;;  %v222_v1 = vld [vmem:[%s182_s4 + $0x28] sm:$0xff]  ;;  %v844_v16 = vmov 0.0   ;;  %vm347_vm0 = vcmask 261120   ;;  %vm845_vm1 = vmmov 0   ;;  %v292_v21 = vlaneseq }
  0x2d   : > { %v217_v2 = vld [vmem:[%s182_s4] sm:$0xff]  ;;  %v227_v3 = vadd.f32 %v222_v1, %v221_v0  ;;  %v218_v4 = vld [vmem:[%s182_s4 + $0x8] sm:$0xff]  ;;  %v223_v5 = vld [vmem:[%s182_s4 + $0x30] sm:$0xff]  ;;  %v231_v15 = vmax.f32 %v221_v0, %v222_v1  ;;  %645 = vmatprep.subr.mxu0 %v844_v16  ;;  %650 = vmatprep.subr.mxu1 %v844_v16  ;;  %vm429_vm2 = vcmask 15360   ;;  %vm303_vm3 = vcmask 130112   ;;  %s634_s21 = sshll.u32 %s831_s15, 4 }
  0x2e   : > { %v224_v6 = vld [vmem:[%s182_s4 + $0x38] sm:$0xff]  ;;  %v225_v7 = vadd.f32 %v218_v4, %v217_v2  ;;  %v219_v8 = vld [vmem:[%s182_s4 + $0x10] sm:$0xff]  ;;  %v229_v13 = vmax.f32 %v217_v2, %v218_v4  ;;  %v346_v17 = vld [vmem:[%s1031_s1] sm:$0x3]  ;;  %647 = vmatprep.mubr.msk.f32.mxu0 %vm845_vm1, %v844_v16  ;;  %658 = vmatprep.mubr.msk.f32.mxu1 %vm845_vm1, %v844_v16  ;;  %v293_v22 = vand.u32 127, %v292_v21  ;;  %v295_v25 = vshrl.u32 %v292_v21, 7 }
  0x2f   : > { %v220_v9 = vld [vmem:[%s182_s4 + $0x18] sm:$0xff]  ;;  %268 = vadd.xlane.f32.xlu1 %v227_v3  ;;  %v228_v10 = vadd.f32 %v224_v6, %v223_v5  ;;  %v232_v14 = vmax.f32 %v223_v5, %v224_v6  ;;  %646 = vmatpush3.xpose.msk.msra.mxu0 %vm347_vm0, %v346_v17  ;;  %v427_v19 = vld [vmem:[%s1032_s2 + $0x10] sm:$0xff]  ;;  %v426_v20 = vld [vmem:[%s1032_s2 + $0x8] sm:$0xff]  ;;  %vm310_vm4 = vcmask 195712   ;;  %vm317_vm5 = vcmask 261312   ;;  %s203_s22 = scalar_lea.vmem [#allocation7], %s951_s28  ;;  %s988_s4 = scalar_lea.hbm %s1033_s3, %s634_s21 }
  0x30   : > { %264 = vadd.xlane.f32.xlu0 %v225_v7  ;;  %v226_v11 = vadd.f32 %v220_v9, %v219_v8  ;;  %v230_v12 = vmax.f32 %v219_v8, %v220_v9  ;;  %v428_v18 = vld [vmem:[%s1032_s2 + $0x18] sm:$0xff]  ;;  %v298_v24 = vadd.s32 4294967288, %v293_v22  ;;  %v305_v27 = vadd.s32 4294967280, %v293_v22  ;;  %v425_v58 = vld [vmem:[%s1032_s2] sm:$0xff]  ;;  %s540_s23 = sshll.u32 %s203_s22, 4  ;;  %s528_s24 = scalar_lea.sflag [#allocation6], %s951_s28  ;;  %s541_s23 = int_to_ptr.vmem [resolvable:$true] %s540_s23 }
  0x31   : > { %651 = vmatpush3.xpose.msk.msra.mxu1 %vm429_vm2, %v428_v18  ;;  %v296_v30 = vsub.s32 %v293_v22, %v295_v25  ;;  %v312_v32 = vadd.s32 4294967272, %v293_v22  ;;  %vm344_vm6 = vcmask 1040384   ;;  %vm525_vm7 = vcmask 253952   ;;  %s759_s5 = scalar_lea.vmem %s541_s23, 16  ;;  %s846_s6 = smov [#allocation7]  }
  0x32   : > { %652 = vmatprep.subr.mxu1 %v844_v16  ;;  %v301_v29 = vsub.s32 %v298_v24, %v295_v25  ;;  %v308_v35 = vsub.s32 %v305_v27, %v295_v25  ;;  %p760_p8 = scmp.ne.s32.totalorder %s541_s23, %s759_s5  ;;  %s763_s7 = sshll.u32 %s846_s6, 4  ;;  %s764_s7 = int_to_ptr.vmem [resolvable:$false] %s763_s7 }
  0x33   : > { %270 = vadd.xlane.f32.xlu1 %v228_v10  ;;  %v315_v40 = vsub.s32 %v312_v32, %v295_v25  ;;  %s765_s15 = scalar_lea.vmem %s764_s7, 32  ;;  %p766_p1 = scmp.lt.s32.totalorder %s541_s23, %s764_s7 }
  0x34   : > { %266 = vadd.xlane.f32.xlu0 %v226_v11  ;;  %p761_p12 = pnand %p760_p8, %p918_p9  ;;  %p767_p3 = scmp.lt.s32.totalorder %s765_s15, %s759_s5 }
  0x35   : > { %653 = vmatpush3.xpose.msk.msra.mxu1 %vm429_vm2, %v427_v19 }
  0x36   : > { %654 = vmatprep.subr.mxu1 %v844_v16  ;;  %p762_p0 = pneg %p761_p12  ;;  %p768_p5 = por %p767_p3, %p766_p1 }
  0x37   : > { %282 = vmax.xlane.f32.xlu1 %v230_v12 }
  0x38   : > { %280 = vmax.xlane.f32.xlu0 %v229_v13  ;;  %p769_p6 = pnand %p768_p5, %p762_p0 }
  0x39   : > { %655 = vmatpush3.xpose.msk.msra.mxu1 %vm429_vm2, %v426_v20 }
  0x3a   : > { %656 = vmatprep.subr.mxu1 %v844_v16 }
  0x3b   : > { %286 = vmax.xlane.f32.xlu1 %v232_v14 }
  0x3c   : > { %284 = vmax.xlane.f32.xlu0 %v231_v15 }
  0x3d   : > { %657 = vmatpush3.xpose.msk.msra.mxu1 %vm429_vm2, %v425_v58 }
  0xb8   : > { %v269_v23 = vpop.xlane.xlu1 %268 }
  0xb9   : > { %v265_v26 = vpop.xlane.xlu0 %264  ;;  %v274_v36 = vmul.f32 0.00390625, %v269_v23 }
  0xba   : > { %v272_v31 = vmul.f32 0.00390625, %v265_v26 }
  0xbb   : > { %v309_v46 = vrot.slane %v274_v36, %v308_v35 }
  0xbc   : > { %v271_v28 = vpop.xlane.xlu1 %270  ;;  %v297_v39 = vrot.slane %v272_v31, %v296_v30 }
  0xbd   : > { %v267_v33 = vpop.xlane.xlu0 %266  ;;  %v275_v41 = vmul.f32 0.00390625, %v271_v28 }
  0xbe   : > { %v273_v34 = vmul.f32 0.00390625, %v267_v33 }
  0xbf   : > { %v316_v48 = vrot.slane %v275_v41, %v315_v40 }
  0xc0   : > { %v302_v37 = vrot.slane %v273_v34, %v301_v29  ;;  %v283_v38 = vpop.xlane.xlu1 %282 }
  0xc1   : > { %v281_v42 = vpop.xlane.xlu0 %280  ;;  %v331_v44 = vrot.slane %v283_v38, %v301_v29 }
  0xc2   : > { %v304_v43 = vsel %vm303_vm3, %v302_v37, %v297_v39  ;;  %v327_v45 = vrot.slane %v281_v42, %v296_v30 }
  0xc3   : > { %v311_v52 = vsel %vm310_vm4, %v309_v46, %v304_v43 }
  0xc4   : > { %v287_v47 = vpop.xlane.xlu1 %286  ;;  %v332_v53 = vsel %vm303_vm3, %v331_v44, %v327_v45  ;;  %v318_v56 = vsel %vm317_vm5, %v316_v48, %v311_v52 }
  0xc5   : > { %v285_v49 = vpop.xlane.xlu0 %284  ;;  %v341_v50 = vrot.slane %v287_v47, %v315_v40 }
  0xc6   : > { %v336_v51 = vrot.slane %v285_v49, %v308_v35 }
  0xc8   : > { %v337_v54 = vsel %vm310_vm4, %v336_v51, %v332_v53 }
  0xc9   : > { %v342_v55 = vsel %vm317_vm5, %v341_v50, %v337_v54 }
  0xca   : > { %v345_v57 = vsel %vm344_vm6, %v318_v56, %v342_v55 }
  0xcb   : > { %648 = vmatmul.mubr.msk.f32.vlgmr.msra.gmra.mxu0 %vm347_vm0, %v345_v57 }
 0x18b   : > { %v420_v59 = vpop.f32.mrf.mxu0 }
 0x18c   : > { %v424_v60 = vmax.f32 %v420_v59, 0.0 }
 0x18d   : > { %v649_v61 = vpop.f32.mrf.mxu0 }
 0x18e   : > { %659 = vmatmul.mubr.msk.f32.vlgmr.msra.gmra.mxu1 %vm429_vm2, %v424_v60 }
 0x24e   : > { %v511_v62 = vpop.f32.mrf.mxu1 }
 0x24f   : > { %v516_v63 = vrot.slane %v511_v62, 1 }
 0x250   : > { %v660_v0 = vpop.f32.mrf.mxu1 }
 0x251   : > { %v518_v1 = vadd.f32 %v516_v63, %v511_v62 }
 0x253   : > { %v633_v2 = vmul.f32 -1.442695, %v518_v1 }
 0x255   : > { %727 = vpow2.f32 %v633_v2 }
 0x262   : > { %v728_v3 = vpop.eup %727 }
 0x263   : > { %v522_v4 = vadd.f32 1.0, %v728_v3 }
 0x265   : > { %729 = vrcp.f32 %v522_v4 }
 0x272   : > { %v730_v5 = vpop.eup %729 }
 0x273   : > { %526 = vst.msk [vmem:[%s203_s22] sm:$0x1] %vm525_vm7, %v730_v5 }
 0x274   : > { %772 = shalt.err (!%p769_p6)
}
 0x275   : > { %s773_s8 = scalar_lea.hbm %s988_s4, 16  ;;  %s777_s10 = scalar_lea.hbm %s1033_s3, 32 }
 0x276   : > { %p774_p7 = scmp.ne.s32.totalorder %s988_s4, %s773_s8  ;;  %p778_p13 = scmp.lt.s32.totalorder %s988_s4, %s1033_s3 }
 0x277   : > { %p779_p2 = scmp.lt.s32.totalorder %s777_s10, %s773_s8 }
 0x278   : > { %p775_p10 = pnand %p774_p7, %p918_p9 }
 0x279   : > { %p780_p8 = por %p779_p2, %p778_p13 }
 0x27a   : > { %p776_p4 = pneg %p775_p10 }
 0x27c   : > { %p781_p12 = pnand %p780_p8, %p776_p4 }
 0x27e   : > { %784 = shalt.err (!%p781_p12)
}
 0x27f   : > { %663 = dma.vmem_to_hbm [thread:$0]  (%p918_p9), %s541_s23, 16, %s988_s4, %s528_s24  }
 0x280 PF: > { %s552_s19 = sand.u32 1, %s819_s12   ;;  %p1039_p0 = scmp.ge.s32.totalorder %s839_s17, 2 }
 0x281   : > { %s553_s21 = scalar_lea.sflag [#allocation6], %s552_s19 }
 0x282   : > { %p670_p1 = pnand %p1039_p0, %p925_p11 }
 0x284   : > { %p671_p3 = pneg %p670_p1 }
 0x286   : > { %814 = dma.done.wait (%p671_p3), %s553_s21, 16  }
 0x287   : > { %816 = vsyncadd (%p671_p3), %s553_s21, 4294967280  ;;  %s19_s17 = sadd.s32 1, %s839_s17   ;;  %s1040_s12 = smov %s823_s13 }
 0x288   : > { %p16_p5 = scmp.ge.s32.totalorder %s19_s17, 4   ;;  %s1041_s13 = smov %s827_s14 }
 0x289   : > { %s1042_s14 = smov %s923_s26  ;;  %s1043_s15 = smov %s835_s16 }
 0x28a   : > { %s1044_s16 = smov %s1046_s20  ;;  %18 = sbr.rel (!%p16_p5) target bundleno = 6 (0x6), region = 85 }
 0x28f   :  { %557 = vsyncpa [#allocation5], 1 }
 0x290   :  { %559 = vsyncpa [#allocation5 + $0x1], 1 }
 0x291   :  { %560 = vsyncpa [#allocation6], 1 }
 0x292   :  { %562 = vsyncpa [#allocation6 + $0x1], 1 }

</bundles_post_ra>
